<compile_context>
chip_gen: v5e
topology: v5e:2x2
jax: 0.10.0
libtpu: 0.0.40
codegen_flags: <defaults>
</compile_context>

<pallas_src>
import numpy as np
import jax
import jax.numpy as jnp
from jax.experimental import pallas as pl
from jax.experimental.pallas import tpu as pltpu

_LANE = 128


def _fused_kernel(x_ref, w1_ref, b1_ref, w2_ref, b2_ref, o_ref):
    """relu(W2 @ relu(W1f @ x + b1f) + b2 + x) for one (batch, length-tile).

    Channels on sublanes, positions on lanes:
      x_ref : (C, TL)     input block (residual source)
      w1_ref: (Cmid, C)   BN-folded Conv1 weight (MXU dtype, e.g. bf16)
      b1_ref: (Cmid, 1)   BN-folded Conv1 bias + shift, f32
      w2_ref: (C, Cmid)   Conv2 weight (MXU dtype)
      b2_ref: (C, 1)      Conv2 bias, f32
      o_ref : (C, TL)     output block
    """
    x = x_ref[...].astype(jnp.float32)          # residual kept in f32
    x_mx = x.astype(w1_ref.dtype)               # MXU input dtype

    # Conv1 (k=1) + folded BatchNorm, then ReLU.
    h = jnp.dot(w1_ref[...], x_mx, preferred_element_type=jnp.float32)
    h = jnp.maximum(h + b1_ref[...], 0.0)       # (Cmid, TL), f32

    # Conv2 (k=1) + bias, residual add, final ReLU.
    y = jnp.dot(w2_ref[...], h.astype(w2_ref.dtype),
                preferred_element_type=jnp.float32)
    o_ref[...] = jnp.maximum(y + b2_ref[...] + x, 0.0).astype(o_ref.dtype)


def conv_bn_relu_res1d(x_ncl, params, *, tl=512, mxu_dtype=jnp.bfloat16):
    """Fused ConvBNReLURes1D forward.

    x_ncl : (N, C, L), PyTorch Conv1d layout.  Returns (N, C, L).
    params: (w1f, b1f, w2, b2) with BatchNorm folded into Conv1 (see init_params).
    tl    : length tile (lane dim); multiple of 128.
    mxu_dtype : dtype fed to the MXU (bf16); accumulation is f32.
    """
    N, C, L = x_ncl.shape
    w1f, b1f, w2, b2 = params
    Cmid = w1f.shape[0]

    # Length tiling.  Always pad L to a multiple of 128 so the output block is
    # lane-dense (unmasked stores).  k=1 conv => padded columns are independent
    # and sliced off afterwards.
    tl = max(_LANE, (tl // _LANE) * _LANE)
    if L <= tl:
        tl_eff = ((L + _LANE - 1) // _LANE) * _LANE
        L_pad = tl_eff
    else:
        tl_eff = tl
        L_pad = ((L + tl_eff - 1) // tl_eff) * tl_eff
    x_p = x_ncl if L_pad == L else jnp.pad(x_ncl, ((0, 0), (0, 0), (0, L_pad - L)))

    # Only the matmul operands are cast to the MXU dtype; biases stay f32.
    w1c = w1f.astype(mxu_dtype)
    w2c = w2.astype(mxu_dtype)
    b1c = b1f.astype(jnp.float32)
    b2c = b2.astype(jnp.float32)

    grid = (N, L_pad // tl_eff)

    # VMEM budget: double-buffered in/out tiles + resident weights.  Cap at
    # 48 MiB so v7x's 64 MiB physical VMEM keeps headroom.
    w_itemsize = np.dtype(mxu_dtype).itemsize
    x_itemsize = np.dtype(x_p.dtype).itemsize
    tile_bytes = C * tl_eff * x_itemsize
    weight_bytes = 2 * C * Cmid * w_itemsize + (Cmid + C) * 4
    vmem_est = 2 * (2 * tile_bytes) + 2 * weight_bytes + Cmid * tl_eff * 4
    vmem_limit = int(min(max(4 * vmem_est, 32 << 20), 48 << 20))

    flops = 4 * N * L_pad * C * Cmid  # two k=1 conv matmuls
    bytes_accessed = (2 * N * L_pad * C * x_itemsize
                      + 2 * C * Cmid * w_itemsize + (Cmid + C) * 4)

    out = pl.pallas_call(
        _fused_kernel,
        out_shape=jax.ShapeDtypeStruct((N, C, L_pad), x_ncl.dtype),
        grid_spec=pltpu.PrefetchScalarGridSpec(
            num_scalar_prefetch=0,
            grid=grid,
            in_specs=[
                pl.BlockSpec((None, C, tl_eff), lambda n, l: (n, 0, l)),  # x
                pl.BlockSpec((Cmid, C), lambda n, l: (0, 0)),             # W1 (BN folded)
                pl.BlockSpec((Cmid, 1), lambda n, l: (0, 0)),             # b1 (folded)
                pl.BlockSpec((C, Cmid), lambda n, l: (0, 0)),             # W2
                pl.BlockSpec((C, 1), lambda n, l: (0, 0)),                # b2
            ],
            out_specs=pl.BlockSpec((None, C, tl_eff), lambda n, l: (n, 0, l)),
        ),
        compiler_params=pltpu.CompilerParams(
            dimension_semantics=("parallel", "parallel"),
            vmem_limit_bytes=vmem_limit),
        cost_estimate=pl.CostEstimate(
            flops=flops, transcendentals=0, bytes_accessed=bytes_accessed),
    )(x_p, w1c, b1c, w2c, b2c)

    return out if L_pad == L else out[:, :, :L]


def init_params(key, channel, res_expansion=1.0, eps=1e-5):
    """Synthetic parameters matching the PyTorch module, with BN pre-folded."""
    cmid = int(channel * res_expansion)
    k = jax.random.split(key, 8)
    # Conv1d weights in PyTorch are (out, in, k=1); kept as (out, in).
    w1 = jax.random.normal(k[0], (cmid, channel), jnp.float32) * 0.1
    b1 = jax.random.normal(k[1], (cmid,), jnp.float32) * 0.1
    w2 = jax.random.normal(k[2], (channel, cmid), jnp.float32) * 0.1
    b2 = jax.random.normal(k[3], (channel,), jnp.float32) * 0.1
    # BatchNorm1d(cmid), inference semantics (running stats).
    gamma = 1.0 + 0.1 * jax.random.normal(k[4], (cmid,), jnp.float32)
    beta = 0.1 * jax.random.normal(k[5], (cmid,), jnp.float32)
    running_mean = 0.1 * jax.random.normal(k[6], (cmid,), jnp.float32)
    running_var = 1.0 + 0.1 * jax.random.uniform(k[7], (cmid,), jnp.float32)

    scale = gamma / jnp.sqrt(running_var + eps)
    shift = beta - running_mean * scale
    # Fold BN into Conv1:  BN(W1 x + b1) = (scale*W1) x + (scale*b1 + shift)
    w1f = w1 * scale[:, None]                      # (Cmid, C)
    b1f = (b1 * scale + shift)[:, None]            # (Cmid, 1)

    return (w1f, b1f, w2, b2[:, None])


def reference(x_ncl, params, mxu_dtype=jnp.bfloat16):
    """Pure-JAX reference of the same forward pass (same MXU dtype as kernel)."""
    w1f, b1f, w2, b2 = params
    x = x_ncl.astype(jnp.float32)
    h = jnp.einsum("mc,ncl->nml", w1f.astype(mxu_dtype), x.astype(mxu_dtype),
                   preferred_element_type=jnp.float32) + b1f[None]
    h = jnp.maximum(h, 0.0)
    y = jnp.einsum("cm,nml->ncl", w2.astype(mxu_dtype), h.astype(mxu_dtype),
                   preferred_element_type=jnp.float32) + b2[None]
    return jnp.maximum(y + x, 0.0)


if __name__ == "__main__":
    key = jax.random.PRNGKey(0)
    kx, kp = jax.random.split(key)

    # Small shapes consistent with the module (batch, channel, length).
    # L = 768 with tl = 512 exercises both the multi-tile grid and the
    # pad-to-multiple-of-128 / slice path.
    N, C, L = 2, 8, 768
    x = jax.random.normal(kx, (N, C, L), jnp.float32)
    params = init_params(kp, C, res_expansion=1.0)

    out = conv_bn_relu_res1d(x, params, tl=512, mxu_dtype=jnp.bfloat16)
    out = jax.block_until_ready(out)

    ref = reference(x, params, mxu_dtype=jnp.bfloat16)
    assert out.shape == (N, C, L)
    assert jnp.allclose(out, ref, atol=2e-2, rtol=2e-2), "mismatch vs reference"

    print("KERNEL_OK")
</pallas_src>

<mosaic_0001>
module attributes {stable_mosaic.version = 11 : i64} {
  func.func @_fused_kernel(%arg0: i32, %arg1: i32, %arg2: memref<1x8x512xf32, #tpu.memory_space<vmem>>, %arg3: memref<8x8xbf16, #tpu.memory_space<vmem>>, %arg4: memref<8x1xf32, #tpu.memory_space<vmem>>, %arg5: memref<8x8xbf16, #tpu.memory_space<vmem>>, %arg6: memref<8x1xf32, #tpu.memory_space<vmem>>, %arg7: memref<1x8x512xf32, #tpu.memory_space<vmem>>) attributes {dimension_semantics = [#tpu.dimension_semantics<parallel>, #tpu.dimension_semantics<parallel>], iteration_bounds = array<i64: 2, 2>, scalar_prefetch = 0 : i64, scratch_operands = 0 : i64, tpu.core_type = #tpu.core_type<tc>, window_params = [{transform_indices = @transform_0, window_bounds = array<i64: 1, 8, 512>}, {pipeline_mode = #tpu.pipeline_mode<synchronous>, transform_indices = @transform_1, window_bounds = array<i64: 8, 8>}, {pipeline_mode = #tpu.pipeline_mode<synchronous>, transform_indices = @transform_2, window_bounds = array<i64: 8, 1>}, {pipeline_mode = #tpu.pipeline_mode<synchronous>, transform_indices = @transform_3, window_bounds = array<i64: 8, 8>}, {pipeline_mode = #tpu.pipeline_mode<synchronous>, transform_indices = @transform_4, window_bounds = array<i64: 8, 1>}, {transform_indices = @transform_5, window_bounds = array<i64: 1, 8, 512>}]} {
    %c0 = arith.constant 0 : index
    %c0_0 = arith.constant 0 : index
    %c0_1 = arith.constant 0 : index
    %0 = vector.load %arg2[%c0, %c0_0, %c0_1] : memref<1x8x512xf32, #tpu.memory_space<vmem>>, vector<1x8x512xf32>
    %1 = vector.shape_cast %0 : vector<1x8x512xf32> to vector<8x512xf32>
    %2 = arith.truncf %1 : vector<8x512xf32> to vector<8x512xbf16>
    %c0_2 = arith.constant 0 : index
    %c0_3 = arith.constant 0 : index
    %3 = vector.load %arg3[%c0_2, %c0_3] : memref<8x8xbf16, #tpu.memory_space<vmem>>, vector<8x8xbf16>
    %cst = arith.constant dense<0.000000e+00> : vector<8x512xf32>
    %4 = tpu.matmul %3, %2, %cst {dimension_numbers = #tpu.dot_dimension_numbers<[1], [0], [0], [1], [0, 0, 1, 1], [], []>} : vector<8x8xbf16>, vector<8x512xbf16>, vector<8x512xf32> -> vector<8x512xf32>
    %c0_4 = arith.constant 0 : index
    %c0_5 = arith.constant 0 : index
    %5 = vector.load %arg4[%c0_4, %c0_5] : memref<8x1xf32, #tpu.memory_space<vmem>>, vector<8x1xf32>
    %6 = vector.broadcast %5 : vector<8x1xf32> to vector<8x512xf32>
    %7 = arith.addf %4, %6 : vector<8x512xf32>
    %cst_6 = arith.constant 0.000000e+00 : f32
    %8 = vector.broadcast %cst_6 : f32 to vector<8x512xf32>
    %9 = arith.maximumf %7, %8 : vector<8x512xf32>
    %c0_7 = arith.constant 0 : index
    %c0_8 = arith.constant 0 : index
    %10 = vector.load %arg5[%c0_7, %c0_8] : memref<8x8xbf16, #tpu.memory_space<vmem>>, vector<8x8xbf16>
    %11 = arith.truncf %9 : vector<8x512xf32> to vector<8x512xbf16>
    %cst_9 = arith.constant dense<0.000000e+00> : vector<8x512xf32>
    %12 = tpu.matmul %10, %11, %cst_9 {dimension_numbers = #tpu.dot_dimension_numbers<[1], [0], [0], [1], [0, 0, 1, 1], [], []>} : vector<8x8xbf16>, vector<8x512xbf16>, vector<8x512xf32> -> vector<8x512xf32>
    %c0_10 = arith.constant 0 : index
    %c0_11 = arith.constant 0 : index
    %13 = vector.load %arg6[%c0_10, %c0_11] : memref<8x1xf32, #tpu.memory_space<vmem>>, vector<8x1xf32>
    %14 = vector.broadcast %13 : vector<8x1xf32> to vector<8x512xf32>
    %15 = arith.addf %12, %14 : vector<8x512xf32>
    %16 = arith.addf %15, %1 : vector<8x512xf32>
    %cst_12 = arith.constant 0.000000e+00 : f32
    %17 = vector.broadcast %cst_12 : f32 to vector<8x512xf32>
    %18 = arith.maximumf %16, %17 : vector<8x512xf32>
    %c0_13 = arith.constant 0 : index
    %c0_14 = arith.constant 0 : index
    %c0_15 = arith.constant 0 : index
    %19 = vector.load %arg7[%c0_13, %c0_14, %c0_15] : memref<1x8x512xf32, #tpu.memory_space<vmem>>, vector<1x8x512xf32>
    %20 = vector.shape_cast %19 : vector<1x8x512xf32> to vector<8x512xf32>
    %21 = vector.shape_cast %18 : vector<8x512xf32> to vector<1x8x512xf32>
    tpu.vector_store %arg7[%c0_13, %c0_14, %c0_15], %21 {strides = array<i32>} : memref<1x8x512xf32, #tpu.memory_space<vmem>>, vector<1x8x512xf32>,
    return
  }
  func.func @transform_0(%arg0: i32, %arg1: i32) -> (i32, i32, i32) {
    %c0_i32 = arith.constant 0 : i32
    %c0_i32_0 = arith.constant 0 : i32
    return %arg0, %c0_i32, %arg1 : i32, i32, i32
  }
  func.func @transform_1(%arg0: i32, %arg1: i32) -> (i32, i32) {
    %c0_i32 = arith.constant 0 : i32
    %c0_i32_0 = arith.constant 0 : i32
    %c0_i32_1 = arith.constant 0 : i32
    return %c0_i32, %c0_i32_0 : i32, i32
  }
  func.func @transform_2(%arg0: i32, %arg1: i32) -> (i32, i32) {
    %c0_i32 = arith.constant 0 : i32
    %c0_i32_0 = arith.constant 0 : i32
    %c0_i32_1 = arith.constant 0 : i32
    return %c0_i32, %c0_i32_0 : i32, i32
  }
  func.func @transform_3(%arg0: i32, %arg1: i32) -> (i32, i32) {
    %c0_i32 = arith.constant 0 : i32
    %c0_i32_0 = arith.constant 0 : i32
    %c0_i32_1 = arith.constant 0 : i32
    return %c0_i32, %c0_i32_0 : i32, i32
  }
  func.func @transform_4(%arg0: i32, %arg1: i32) -> (i32, i32) {
    %c0_i32 = arith.constant 0 : i32
    %c0_i32_0 = arith.constant 0 : i32
    %c0_i32_1 = arith.constant 0 : i32
    return %c0_i32, %c0_i32_0 : i32, i32
  }
  func.func @transform_5(%arg0: i32, %arg1: i32) -> (i32, i32, i32) {
    %c0_i32 = arith.constant 0 : i32
    %c0_i32_0 = arith.constant 0 : i32
    return %arg0, %c0_i32, %arg1 : i32, i32, i32
  }
}

</mosaic_0001>

<bundles_post_ra>
// kernel: tpu_custom_call.1
= control target key start
LH: loop header
LB: loop body
LE: loop exit
PB: predicated region body
PF: predicated region fallthrough
CT: control target
= control target key end

     0   :  { %10 = vsyncpa [#allocation3], 0  ;;  %s1008_s0 = inlined_call_operand.hbm [shape: f32[2,8,1024], index: 0, kind: input, shape index: {}]   ;;  %s1009_s1 = inlined_call_operand.vmem [shape: bf16[8,8], index: 1, kind: input, shape index: {}]   ;;  %s1010_s2 = inlined_call_operand.vmem [shape: f32[8,1], index: 2, kind: input, shape index: {}]   ;;  %s1011_s3 = inlined_call_operand.vmem [shape: bf16[8,8], index: 3, kind: input, shape index: {}]   ;;  %s1012_s4 = inlined_call_operand.vmem [shape: f32[8,1], index: 4, kind: input, shape index: {}]   ;;  %s1013_s5 = inlined_call_operand.hbm [shape: f32[2,8,1024], index: 5, kind: output, shape index: {}]  }
   0x1   :  { %12 = vsyncpa [#allocation3 + $0x1], 0 }
   0x2   :  { %13 = vsyncpa [#allocation4], 0 }
   0x3   :  { %15 = vsyncpa [#allocation4 + $0x1], 0  ;;  %s814_s18 = smov 0   ;;  %s816_s19 = smov 0  }
   0x4   :  { %s818_s20 = smov 0   ;;  %s820_s21 = smov 0  }
   0x5   :  { %s822_s22 = smov 0   ;;  %s824_s23 = smov 0  }
   0x6   :  { %s826_s24 = smov 0   ;;  %s828_s25 = smov 0  }
   0x7 LB: > { %s548_s26 = sadd.s32 4294967295, %s781_s25   ;;  %s549_s27 = sadd.s32 4294967294, %s781_s25   ;;  %s781_s25 = sphi %s828_s25, %s21_s25   ;;  %s777_s24 = sphi %s826_s24, %s1033_s24   ;;  %s773_s23 = sphi %s824_s23, %s1032_s23   ;;  %s769_s22 = sphi %s822_s22, %s1031_s22   ;;  %s765_s21 = sphi %s820_s21, %s1030_s21   ;;  %s761_s20 = sphi %s818_s20, %s1029_s20   ;;  %s757_s19 = sphi %s816_s19, %s1028_s19   ;;  %s753_s18 = sphi %s814_s18, %s1027_s18  }
   0x8   : > { %s30_s28 = sadd.s32 1, %s773_s23  ;;  %s33_s29 = sadd.s32 1, %s777_s24 }
   0x9   : > { %p31_p0 = scmp.ge.s32.totalorder %s30_s28, 2  ;;  %s42_s30 = sadd.s32 1, %s761_s20 }
   0xa   : > { %p49_p1 = scmp.ne.s32.totalorder %s761_s20, %s757_s19  ;;  %p50_p2 = scmp.eq.s32.totalorder %s781_s25, 0 }
   0xb   : > { %s1035_s28 = smov (%p31_p0, %s30_s28), 0  ;;  %s1037_s29 = smov (!%p31_p0, %s33_s29), %s777_s24 }
   0xc   : > { %1017 = sst [smem:[#allocation8_spill]] %s1035_s28  ;;  %s38_s6 = ssub.s32 %s773_s23, %s1035_s28 }
   0xd   : > { %p867_p3 = por %p50_p2, %p49_p1  ;;  %p35_p4 = scmp.ge.s32.totalorder %s1037_s29, 2 }
   0xe   : > { %p55_p5 = scmp.ne.s32.totalorder %s757_s19, %s753_s18  ;;  %p56_p6 = scmp.eq.s32.totalorder %s548_s26, 0 }
   0xf   : > { %p165_p7 = scmp.eq.s32.totalorder %s548_s26, 3  ;;  %s1039_s29 = smov (%p35_p4, %s1037_s29), 0 }
  0x10   : > { %1019 = sst [smem:[#allocation9_spill]] %s1039_s29  ;;  %p875_p8 = por %p56_p6, %p55_p5 }
  0x11   : > { %p879_p9 = por %p165_p7, %p49_p1  ;;  %s37_s10 = ssub.s32 %s777_s24, %s1039_s29 }
  0x12   : > { %p171_p10 = scmp.eq.s32.totalorder %s549_s27, 3  ;;  %s39_s11 = sor.u32 %s38_s6, %s37_s10 }
  0x13   : > { %p40_p11 = scmp.eq.s32.totalorder %s39_s11, 0  ;;  %p585_p13 = scmp.lt.s32.totalorder %s781_s25, 4 }
  0x14   : > { %p885_p12 = por %p171_p10, %p55_p5  ;;  %s203_s13 = sand.u32 1, %s761_s20  }
  0x15   : > { %s892_s14 = scalar_select %p40_p11, %s761_s20, %s42_s30  }
  0x16   : > { %s1022_s12 = scalar_select %p885_p12, 1, 0 }
  0x17   : > { %s552_s15 = sshll.u32 %s203_s13, 5  ;;  %s553_s16 = sshll.u32 %s773_s23, 2 }
  0x18   : > { %1023 = sst [smem:[#allocation10_spill]] %s1022_s12  ;;  %s554_s17 = sshll.u32 %s777_s24, 3 }
  0x19   : > { %s207_s26 = scalar_lea.vmem [#allocation2], %s552_s15  ;;  %s212_s29 = sadd.s32 %s554_s17, %s553_s16 }
  0x1a   : > { %s218_s28 = sshll.u32 %s207_s26, 4  ;;  %s555_s27 = sshll.u32 %s212_s29, 3  ;;  %s219_s28 = int_to_ptr.vmem [resolvable:$true] %s218_s28 }
  0x1b   : > { %p578_p0 = pnand %p585_p13, %p867_p3  ;;  %s214_s11 = scalar_lea.hbm %s1008_s0, %s555_s27 }
  0x1c   : > { %p556_p1 = scmp.ge.s32.totalorder %s781_s25, 1  ;;  %s216_s12 = sshll.u32 %s214_s11, 4  ;;  %s217_s12 = int_to_ptr.hbm [resolvable:$true] %s216_s12 }
  0x1d   : > { %p223_p2 = scmp.lt.s32.totalorder %s781_s25, 5  ;;  %s204_s30 = scalar_lea.sflag [#allocation3], %s203_s13 }
  0x1e   : > { %580 = dma.hbm_to_vmem [thread:$0]  (!%p578_p0), %s217_s12, 512, %s219_s28, %s204_s30  }
  0x1f   : > { %p224_p4 = pnand %p556_p1, %p223_p2 }
  0x20   : > { %s904_s15 = sand.u32 (!%p224_p4), 1, %s757_s19  }
  0x21   : > { %227 = sbr.rel (%p224_p4) target bundleno = 331 (0x14b), region = 40  ;;  %s557_s29 = sshll.u32 (!%p224_p4), %s904_s15, 5 }
  0x22   : > { %s230_s7 = scalar_lea.sflag (!%p224_p4), [#allocation3], %s904_s15  ;;  %s233_s16 = scalar_lea.vmem (!%p224_p4), [#allocation2], %s557_s29 }
  0x26   : > { %744 = dma.done.wait (%p875_p8), %s230_s7, 512  }
  0x27   : > { %746 = vsyncadd (%p875_p8), %s230_s7, 4294966784  ;;  %v783_v0 = vmov 0   ;;  %v914_v1 = vld [vmem:[%s233_s16] sm:$0xff]  ;;  %vm283_vm0 = vcmask 1043456   ;;  %v916_v2 = vld [vmem:[%s233_s16 + $0x8] sm:$0xff]  ;;  %vm279_vm1 = vcmask 64512  }
  0x28   : > { %652 = vset.pattern.permute.xlu0 %v783_v0  ;;  %v918_v3 = vld [vmem:[%s233_s16 + $0x10] sm:$0xff]  ;;  %v268_v4 = vpack.c.bf16 %v914_v1, %v914_v1  ;;  %v269_v5 = vpack.c.bf16 %v916_v2, %v916_v2  ;;  %v926_v7 = vld [vmem:[%s233_s16 + $0x18] sm:$0xff]  ;;  %v273_v8 = vld [vmem:[%s1010_s2] sm:$0xff]  ;;  %s568_s10 = sshll.u32 %s765_s21, 2  ;;  %s569_s11 = sshll.u32 %s769_s22, 3 }
  0x29   : > { %v270_v6 = vpack.c.bf16 %v918_v3, %v918_v3  ;;  %v271_v9 = vpack.c.bf16 %v926_v7, %v926_v7  ;;  %276 = vperm.xlu0 %652, %v273_v8   ;;  %v272_v14 = vld [vmem:[%s1009_s1] sm:$0xf]  ;;  %s260_s30 = scalar_lea.vmem [#allocation5], %s557_s29  ;;  %s454_s7 = sadd.s32 %s569_s11, %s568_s10 }
  0x2a   : > { %v285_v10 = vsel %vm283_vm0, %v268_v4, 0  ;;  %v288_v11 = vsel %vm283_vm0, %v269_v5, 0  ;;  %v357_v15 = vld [vmem:[%s1012_s4] sm:$0xff]  ;;  %s570_s16 = sshll.u32 %s454_s7, 3  ;;  %s458_s21 = sshll.u32 %s260_s30, 4  ;;  %s459_s21 = int_to_ptr.vmem [resolvable:$true] %s458_s21 }
  0x2b   : > { %v291_v12 = vsel %vm283_vm0, %v270_v6, 0  ;;  %303 = vmatpush.bf16.msra.mxu0 %v285_v10  ;;  %316 = vmatpush.bf16.msra.mxu1 %v288_v11  ;;  %v294_v13 = vsel %vm283_vm0, %v271_v9, 0  ;;  %v352_v31 = vld [vmem:[%s1011_s3] sm:$0xf]  ;;  %s456_s12 = scalar_lea.hbm %s1013_s5, %s570_s16  ;;  %s443_s29 = scalar_lea.sflag [#allocation4], %s904_s15 }
  0x2c   : > { %329 = vmatpush.bf16.msra.mxu2 %v291_v12  ;;  %342 = vmatpush.bf16.msra.mxu3 %v294_v13  ;;  %s460_s22 = sshll.u32 %s456_s12, 4  ;;  %s703_s6 = scalar_lea.hbm %s1013_s5, 128  ;;  %s461_s22 = int_to_ptr.hbm [resolvable:$true] %s460_s22 }
  0x2d   : > { %s697_s13 = sshra.s32 %s461_s22, 4  ;;  %s698_s13 = int_to_ptr.hbm [resolvable:$true] %s697_s13 }
  0x2e   : > { %559 = vmatmul.msk.bf16.vlgmr.msra.gmra.mxu0 %vm279_vm1, %v272_v14  ;;  %560 = vmatmul.msk.bf16.vlgmr.msra.gmra.mxu1 %vm279_vm1, %v272_v14  ;;  %s699_s17 = scalar_lea.hbm %s698_s13, 32  ;;  %p704_p7 = scmp.lt.s32.totalorder %s698_s13, %s1013_s5 }
  0x2f   : > { %561 = vmatmul.msk.bf16.vlgmr.msra.gmra.mxu2 %vm279_vm1, %v272_v14  ;;  %562 = vmatmul.msk.bf16.vlgmr.msra.gmra.mxu3 %vm279_vm1, %v272_v14  ;;  %p700_p3 = scmp.ne.s32.totalorder %s698_s13, %s699_s17  ;;  %p705_p8 = scmp.lt.s32.totalorder %s703_s6, %s699_s17 }
  0x31   : > { %360 = vperm.xlu0 %652, %v357_v15   ;;  %p701_p5 = pnand %p700_p3, %p879_p9  ;;  %p706_p10 = por %p705_p8, %p704_p7 }
  0x33   : > { %p702_p6 = pneg %p701_p5 }
  0x35   : > { %p707_p11 = pnand %p706_p10, %p702_p6 }
  0x9b   : > { %v277_v16 = vpop.permute.xlu0 %276 }
  0xa3   : > { %v361_v42 = vpop.permute.xlu0 %360 }
  0xab   : > { %v305_v17 = vpop.f32.mrf.mxu0  ;;  %v318_v18 = vpop.f32.mrf.mxu1 }
  0xac   : > { %v306_v19 = vadd.f32 %v305_v17, %v277_v16  ;;  %v319_v20 = vadd.f32 %v318_v18, %v277_v16 }
  0xae   : > { %v348_v21 = vmax.f32 %v306_v19, 0.0  ;;  %v349_v22 = vmax.f32 %v319_v20, 0.0 }
  0xb0   : > { %v353_v23 = vpack.c.bf16 %v348_v21, %v348_v21  ;;  %v354_v24 = vpack.c.bf16 %v349_v22, %v349_v22 }
  0xb2   : > { %v331_v25 = vpop.f32.mrf.mxu2  ;;  %v344_v26 = vpop.f32.mrf.mxu3  ;;  %v367_v27 = vsel %vm283_vm0, %v353_v23, 0  ;;  %v370_v28 = vsel %vm283_vm0, %v354_v24, 0 }
  0xb3   : > { %v332_v29 = vadd.f32 %v331_v25, %v277_v16  ;;  %v345_v30 = vadd.f32 %v344_v26, %v277_v16  ;;  %385 = vmatpush.bf16.msrb.mxu0 %v367_v27  ;;  %398 = vmatpush.bf16.msrb.mxu1 %v370_v28  ;;  %v307_v32 = vpop.f32.mrf.mxu0  ;;  %v320_v33 = vpop.f32.mrf.mxu1 }
  0xb5   : > { %v350_v34 = vmax.f32 %v332_v29, 0.0  ;;  %v351_v35 = vmax.f32 %v345_v30, 0.0 }
  0xb6   : > { %563 = vmatmul.msk.bf16.vlgmr.msrb.gmra.mxu0 %vm279_vm1, %v352_v31  ;;  %564 = vmatmul.msk.bf16.vlgmr.msrb.gmra.mxu1 %vm279_vm1, %v352_v31 }
  0xb7   : > { %v355_v36 = vpack.c.bf16 %v350_v34, %v350_v34  ;;  %v356_v37 = vpack.c.bf16 %v351_v35, %v351_v35 }
  0xb9   : > { %v373_v38 = vsel %vm283_vm0, %v355_v36, 0  ;;  %v376_v39 = vsel %vm283_vm0, %v356_v37, 0 }
  0xba   : > { %v333_v40 = vpop.f32.mrf.mxu2  ;;  %v346_v41 = vpop.f32.mrf.mxu3  ;;  %411 = vmatpush.bf16.msrb.mxu2 %v373_v38  ;;  %424 = vmatpush.bf16.msrb.mxu3 %v376_v39 }
  0xbd   : > { %565 = vmatmul.msk.bf16.vlgmr.msrb.gmra.mxu2 %vm279_vm1, %v352_v31  ;;  %566 = vmatmul.msk.bf16.vlgmr.msrb.gmra.mxu3 %vm279_vm1, %v352_v31 }
 0x133   : > { %v387_v43 = vpop.f32.mrf.mxu0  ;;  %v400_v44 = vpop.f32.mrf.mxu1 }
 0x134   : > { %v388_v45 = vadd.f32 %v387_v43, %v361_v42  ;;  %v401_v46 = vadd.f32 %v400_v44, %v361_v42 }
 0x136   : > { %v430_v47 = vadd.f32 %v388_v45, %v914_v1  ;;  %v431_v48 = vadd.f32 %v401_v46, %v916_v2 }
 0x138   : > { %v434_v49 = vmax.f32 %v430_v47, 0.0  ;;  %v435_v50 = vmax.f32 %v431_v48, 0.0 }
 0x13a   : > { %438 = vst [vmem:[%s260_s30] sm:$0xff] %v434_v49 }
 0x13b   : > { %439 = vst [vmem:[%s260_s30 + $0x8] sm:$0xff] %v435_v50  ;;  %v389_v51 = vpop.f32.mrf.mxu0  ;;  %v402_v52 = vpop.f32.mrf.mxu1 }
 0x140   : > { %v413_v53 = vpop.f32.mrf.mxu2  ;;  %v426_v54 = vpop.f32.mrf.mxu3 }
 0x141   : > { %v414_v55 = vadd.f32 %v413_v53, %v361_v42  ;;  %v427_v56 = vadd.f32 %v426_v54, %v361_v42 }
 0x143   : > { %v432_v57 = vadd.f32 %v414_v55, %v918_v3  ;;  %v433_v58 = vadd.f32 %v427_v56, %v926_v7 }
 0x145   : > { %v436_v59 = vmax.f32 %v432_v57, 0.0  ;;  %v437_v60 = vmax.f32 %v433_v58, 0.0 }
 0x147   : > { %440 = vst [vmem:[%s260_s30 + $0x10] sm:$0xff] %v436_v59 }
 0x148   : > { %441 = vst [vmem:[%s260_s30 + $0x18] sm:$0xff] %v437_v60  ;;  %v415_v61 = vpop.f32.mrf.mxu2  ;;  %v428_v62 = vpop.f32.mrf.mxu3 }
 0x149   : > { %710 = shalt.err (!%p707_p11)
}
 0x14a   : > { %575 = dma.vmem_to_hbm [thread:$0]  (%p879_p9), %s459_s21, 512, %s461_s22, %s443_s29  }
 0x14b PF: > { %p586_p13 = scmp.ge.s32.totalorder %s781_s25, 2  ;;  %s472_s30 = sand.u32 1, %s753_s18  }
 0x14c   : > { %s473_s7 = scalar_lea.sflag [#allocation4], %s472_s30 }
 0x14d   : > { %p582_p0 = pnand %p586_p13, %p885_p12 }
 0x14f   : > { %p583_p1 = pneg %p582_p0 }
 0x151   : > { %748 = dma.done.wait (%p583_p1), %s473_s7, 512  }
 0x152   : > { %750 = vsyncadd (%p583_p1), %s473_s7, 4294966784  ;;  %s21_s25 = sadd.s32 1, %s781_s25   ;;  %s1025_s9 = sld [smem:[#allocation8_spill]] }
 0x153   : > { %p18_p2 = scmp.ge.s32.totalorder %s21_s25, 6   ;;  %s1026_s16 = sld [smem:[#allocation9_spill]] }
 0x154   : > { %s1027_s18 = smov %s757_s19  ;;  %s1028_s19 = smov %s761_s20 }
 0x155   : > { %s1029_s20 = smov %s892_s14  ;;  %s1030_s21 = smov %s773_s23 }
 0x156   : > { %s1031_s22 = smov %s777_s24  ;;  %20 = sbr.rel (!%p18_p2) target bundleno = 7 (0x7), region = 85 }
 0x158   : > { %s1032_s23 = smov %s1025_s9 }
 0x159   : > { %s1033_s24 = smov %s1026_s16 }
 0x15b   :  { %479 = vsyncpa [#allocation3], 1 }
 0x15c   :  { %481 = vsyncpa [#allocation3 + $0x1], 1 }
 0x15d   :  { %482 = vsyncpa [#allocation4], 1 }
 0x15e   :  { %484 = vsyncpa [#allocation4 + $0x1], 1 }

</bundles_post_ra>
